<compile_context>
chip_gen: v6e
topology: v6e:2x2x1
jax: 0.10.0
libtpu: 0.0.40
codegen_flags: <defaults>
</compile_context>

<pallas_src>
import jax
import jax.numpy as jnp
import numpy as np
from jax.experimental import pallas as pl
from jax.experimental.pallas import tpu as pltpu

_EPS = 1e-5


def _basic_block_kernel(x_ref, w1_ref, g1_ref, b1_ref, w2_ref, g2_ref, b2_ref,
                        o_ref):
    """Whole BasicBlock1D forward, fully resident in VMEM / vregs.

    x_ref : (N, C, L)   input (C = Cin = Cout; identity residual)
    w1_ref: (C, 3*C)    conv1 weight, columns ordered tap-major: col = k*C + c
    w2_ref: (C, 3*C)    conv2 weight, same packing
    g*_ref/b*_ref: (C, 1)   bn gamma / beta
    o_ref : (N, C, L)   output
    """
    N, C, L = x_ref.shape
    inv_cnt = 1.0 / float(N * L)
    x_val = x_ref[...]                                   # (N, C, L)

    def im2col(samples):
        # samples: list of N values, each (C, L).
        # Returns the (3*C, N*L) im2col patch:
        #   rows [0:C)    -> tap k=0 -> x[l-1]  (zero at l=0)
        #   rows [C:2C)   -> tap k=1 -> x[l]
        #   rows [2C:3C)  -> tap k=2 -> x[l+1]  (zero at l=L-1)
        # lanes are sample-major: column = n*L + l (shifts never cross samples).
        zc = jnp.zeros((C, 1), jnp.float32)
        tap0 = [jnp.concatenate([zc, s[:, :L - 1]], axis=1) for s in samples]
        tap1 = list(samples)
        tap2 = [jnp.concatenate([s[:, 1:], zc], axis=1) for s in samples]
        rows = [jnp.concatenate(t, axis=1) for t in (tap0, tap1, tap2)]
        return jnp.concatenate(rows, axis=0)             # (3C, N*L)

    def batchnorm(h, g_ref, b_ref):
        # h: (C, N*L); training-mode stats over lanes (i.e. over N and L),
        # biased variance, folded affine scale/shift.
        mu = jnp.sum(h, axis=1, keepdims=True) * inv_cnt
        hc = h - mu
        var = jnp.sum(hc * hc, axis=1, keepdims=True) * inv_cnt
        scale = g_ref[...] * jax.lax.rsqrt(var + _EPS)
        return hc * scale + b_ref[...]

    # ---- conv1 (one MXU matmul for all taps + batch) + bn1 + relu.
    p1 = im2col([x_val[n] for n in range(N)])
    h = jnp.dot(w1_ref[...], p1, preferred_element_type=jnp.float32)  # (C, N*L)
    h = jnp.maximum(batchnorm(h, g1_ref, b1_ref), 0.0)

    # ---- conv2 (Cin == Cout, same patch layout) + bn2.
    p2 = im2col([h[:, n * L:(n + 1) * L] for n in range(N)])
    o = jnp.dot(w2_ref[...], p2, preferred_element_type=jnp.float32)  # (C, N*L)
    o = batchnorm(o, g2_ref, b2_ref)

    # ---- identity residual + relu, written per sample.
    for n in range(N):
        o_ref[n] = jnp.maximum(o[:, n * L:(n + 1) * L] + x_val[n], 0.0)


@jax.jit
def basic_block1d_forward(x, w1, g1, b1, w2, g2, b2):
    """x: (N, C, L) f32; w1/w2: (C, C, 3) PyTorch OIK layout; g*/b*: (C,)."""
    N, Cin, L = x.shape
    Cout = w1.shape[0]
    assert Cin == Cout, "identity residual requires Cin == Cout (downsample=None)"

    # glue (tiny tensors only): pack conv weights tap-major (Cout, 3*Cin) so
    # column index k*Cin + c matches the im2col row layout in the kernel.
    w1p = jnp.transpose(w1, (0, 2, 1)).reshape(Cout, 3 * Cin)
    w2p = jnp.transpose(w2, (0, 2, 1)).reshape(Cout, 3 * Cout)
    g1c, b1c = g1.reshape(Cout, 1), b1.reshape(Cout, 1)
    g2c, b2c = g2.reshape(Cout, 1), b2.reshape(Cout, 1)

    vmem = pl.BlockSpec(memory_space=pltpu.MemorySpace.VMEM)

    flops = 2 * (2 * Cout * (3 * Cin) * N * L) + 20 * N * Cout * L
    bytes_accessed = 4 * (2 * N * Cin * L + w1p.size + w2p.size + 4 * Cout)
    cost = pl.CostEstimate(flops=int(flops), transcendentals=int(2 * Cout),
                           bytes_accessed=int(bytes_accessed))

    return pl.pallas_call(
        _basic_block_kernel,
        out_shape=jax.ShapeDtypeStruct((N, Cout, L), jnp.float32),
        in_specs=[vmem] * 7,
        out_specs=vmem,
        cost_estimate=cost,
    )(x, w1p, g1c, b1c, w2p, g2c, b2c)


def _reference(x, w1, g1, b1, w2, g2, b2):
    """Pure-JAX reference mirroring the PyTorch forward (training-mode BN)."""
    def conv1d(h, w):
        return jax.lax.conv_general_dilated(
            h, w, window_strides=(1,), padding=((1, 1),),
            dimension_numbers=("NCH", "OIH", "NCH"))

    def bn(h, g, b):
        mu = jnp.mean(h, axis=(0, 2), keepdims=True)
        var = jnp.mean((h - mu) ** 2, axis=(0, 2), keepdims=True)
        hn = (h - mu) * jax.lax.rsqrt(var + _EPS)
        return hn * g.reshape(1, -1, 1) + b.reshape(1, -1, 1)

    h = jax.nn.relu(bn(conv1d(x, w1), g1, b1))
    o = bn(conv1d(h, w2), g2, b2) + x
    return jax.nn.relu(o)


if __name__ == "__main__":
    # Small shapes: batch=2, in_channels=out_channels=4, length=16, stride=1,
    # downsample=None (module defaults -> identity residual is valid).
    N, C, L = 2, 4, 16
    key = jax.random.PRNGKey(0)
    kx, kw1, kw2, kg1, kb1, kg2, kb2 = jax.random.split(key, 7)

    x = jax.random.normal(kx, (N, C, L), jnp.float32)
    w1 = 0.2 * jax.random.normal(kw1, (C, C, 3), jnp.float32)   # conv1.weight (O, I, K)
    w2 = 0.2 * jax.random.normal(kw2, (C, C, 3), jnp.float32)   # conv2.weight
    g1 = 1.0 + 0.1 * jax.random.normal(kg1, (C,), jnp.float32)  # bn1.weight
    b1 = 0.1 * jax.random.normal(kb1, (C,), jnp.float32)        # bn1.bias
    g2 = 1.0 + 0.1 * jax.random.normal(kg2, (C,), jnp.float32)  # bn2.weight
    b2 = 0.1 * jax.random.normal(kb2, (C,), jnp.float32)        # bn2.bias

    out = basic_block1d_forward(x, w1, g1, b1, w2, g2, b2)
    out = jax.block_until_ready(out)

    ref = jax.block_until_ready(_reference(x, w1, g1, b1, w2, g2, b2))
    np.testing.assert_allclose(np.asarray(out), np.asarray(ref), rtol=1e-2, atol=1e-2)

    print("KERNEL_OK")
</pallas_src>

<mosaic_0001>
module attributes {stable_mosaic.version = 11 : i64} {
  func.func @_basic_block_kernel(%arg0: memref<2x4x16xf32, #tpu.memory_space<vmem>>, %arg1: memref<4x12xf32, #tpu.memory_space<vmem>>, %arg2: memref<4x1xf32, #tpu.memory_space<vmem>>, %arg3: memref<4x1xf32, #tpu.memory_space<vmem>>, %arg4: memref<4x12xf32, #tpu.memory_space<vmem>>, %arg5: memref<4x1xf32, #tpu.memory_space<vmem>>, %arg6: memref<4x1xf32, #tpu.memory_space<vmem>>, %arg7: memref<2x4x16xf32, #tpu.memory_space<vmem>>) attributes {dimension_semantics = [], scalar_prefetch = 0 : i64, scratch_operands = 0 : i64, tpu.core_type = #tpu.core_type<tc>} {
    %c0 = arith.constant 0 : index
    %c0_0 = arith.constant 0 : index
    %c0_1 = arith.constant 0 : index
    %0 = vector.load %arg0[%c0, %c0_0, %c0_1] : memref<2x4x16xf32, #tpu.memory_space<vmem>>, vector<2x4x16xf32>
    %1 = vector.extract_strided_slice %0 {offsets = [0, 0, 0], sizes = [1, 4, 16], strides = [1, 1, 1]} : vector<2x4x16xf32> to vector<1x4x16xf32>
    %2 = vector.shape_cast %1 : vector<1x4x16xf32> to vector<4x16xf32>
    %3 = vector.extract_strided_slice %0 {offsets = [1, 0, 0], sizes = [1, 4, 16], strides = [1, 1, 1]} : vector<2x4x16xf32> to vector<1x4x16xf32>
    %4 = vector.shape_cast %3 : vector<1x4x16xf32> to vector<4x16xf32>
    %cst = arith.constant 0.000000e+00 : f32
    %5 = vector.broadcast %cst : f32 to vector<4x1xf32>
    %6 = vector.extract_strided_slice %2 {offsets = [0, 0], sizes = [4, 15], strides = [1, 1]} : vector<4x16xf32> to vector<4x15xf32>
    %7 = tpu.concatenate %5, %6 in 1 : vector<4x1xf32>, vector<4x15xf32> -> vector<4x16xf32>
    %8 = vector.extract_strided_slice %4 {offsets = [0, 0], sizes = [4, 15], strides = [1, 1]} : vector<4x16xf32> to vector<4x15xf32>
    %9 = tpu.concatenate %5, %8 in 1 : vector<4x1xf32>, vector<4x15xf32> -> vector<4x16xf32>
    %10 = vector.extract_strided_slice %2 {offsets = [0, 1], sizes = [4, 15], strides = [1, 1]} : vector<4x16xf32> to vector<4x15xf32>
    %11 = tpu.concatenate %10, %5 in 1 : vector<4x15xf32>, vector<4x1xf32> -> vector<4x16xf32>
    %12 = vector.extract_strided_slice %4 {offsets = [0, 1], sizes = [4, 15], strides = [1, 1]} : vector<4x16xf32> to vector<4x15xf32>
    %13 = tpu.concatenate %12, %5 in 1 : vector<4x15xf32>, vector<4x1xf32> -> vector<4x16xf32>
    %14 = tpu.concatenate %7, %9 in 1 : vector<4x16xf32>, vector<4x16xf32> -> vector<4x32xf32>
    %15 = tpu.concatenate %2, %4 in 1 : vector<4x16xf32>, vector<4x16xf32> -> vector<4x32xf32>
    %16 = tpu.concatenate %11, %13 in 1 : vector<4x16xf32>, vector<4x16xf32> -> vector<4x32xf32>
    %17 = tpu.concatenate %14, %15, %16 in 0 : vector<4x32xf32>, vector<4x32xf32>, vector<4x32xf32> -> vector<12x32xf32>
    %c0_2 = arith.constant 0 : index
    %c0_3 = arith.constant 0 : index
    %18 = vector.load %arg1[%c0_2, %c0_3] : memref<4x12xf32, #tpu.memory_space<vmem>>, vector<4x12xf32>
    %cst_4 = arith.constant dense<0.000000e+00> : vector<4x32xf32>
    %19 = tpu.matmul %18, %17, %cst_4 {dimension_numbers = #tpu.dot_dimension_numbers<[1], [0], [0], [1], [0, 0, 1, 1], [], []>} : vector<4x12xf32>, vector<12x32xf32>, vector<4x32xf32> -> vector<4x32xf32>
    %cst_5 = arith.constant dense<0.000000e+00> : vector<4xf32>
    %20 = vector.multi_reduction <add>, %19, %cst_5 [1] : vector<4x32xf32> to vector<4xf32>
    %21 = vector.shape_cast %20 : vector<4xf32> to vector<4x1xf32>
    %cst_6 = arith.constant 3.125000e-02 : f32
    %22 = vector.broadcast %cst_6 : f32 to vector<4x1xf32>
    %23 = arith.mulf %21, %22 : vector<4x1xf32>
    %24 = vector.broadcast %23 : vector<4x1xf32> to vector<4x32xf32>
    %25 = arith.subf %19, %24 : vector<4x32xf32>
    %26 = arith.mulf %25, %25 : vector<4x32xf32>
    %cst_7 = arith.constant dense<0.000000e+00> : vector<4xf32>
    %27 = vector.multi_reduction <add>, %26, %cst_7 [1] : vector<4x32xf32> to vector<4xf32>
    %28 = vector.shape_cast %27 : vector<4xf32> to vector<4x1xf32>
    %cst_8 = arith.constant 3.125000e-02 : f32
    %29 = vector.broadcast %cst_8 : f32 to vector<4x1xf32>
    %30 = arith.mulf %28, %29 : vector<4x1xf32>
    %c0_9 = arith.constant 0 : index
    %c0_10 = arith.constant 0 : index
    %31 = vector.load %arg2[%c0_9, %c0_10] : memref<4x1xf32, #tpu.memory_space<vmem>>, vector<4x1xf32>
    %cst_11 = arith.constant 9.99999974E-6 : f32
    %32 = vector.broadcast %cst_11 : f32 to vector<4x1xf32>
    %33 = arith.addf %30, %32 : vector<4x1xf32>
    %34 = math.rsqrt %33 : vector<4x1xf32>
    %35 = arith.mulf %31, %34 : vector<4x1xf32>
    %36 = vector.broadcast %35 : vector<4x1xf32> to vector<4x32xf32>
    %37 = arith.mulf %25, %36 : vector<4x32xf32>
    %c0_12 = arith.constant 0 : index
    %c0_13 = arith.constant 0 : index
    %38 = vector.load %arg3[%c0_12, %c0_13] : memref<4x1xf32, #tpu.memory_space<vmem>>, vector<4x1xf32>
    %39 = vector.broadcast %38 : vector<4x1xf32> to vector<4x32xf32>
    %40 = arith.addf %37, %39 : vector<4x32xf32>
    %cst_14 = arith.constant 0.000000e+00 : f32
    %41 = vector.broadcast %cst_14 : f32 to vector<4x32xf32>
    %42 = arith.maximumf %40, %41 : vector<4x32xf32>
    %43 = vector.extract_strided_slice %42 {offsets = [0, 0], sizes = [4, 16], strides = [1, 1]} : vector<4x32xf32> to vector<4x16xf32>
    %44 = vector.extract_strided_slice %42 {offsets = [0, 16], sizes = [4, 16], strides = [1, 1]} : vector<4x32xf32> to vector<4x16xf32>
    %cst_15 = arith.constant 0.000000e+00 : f32
    %45 = vector.broadcast %cst_15 : f32 to vector<4x1xf32>
    %46 = vector.extract_strided_slice %43 {offsets = [0, 0], sizes = [4, 15], strides = [1, 1]} : vector<4x16xf32> to vector<4x15xf32>
    %47 = tpu.concatenate %45, %46 in 1 : vector<4x1xf32>, vector<4x15xf32> -> vector<4x16xf32>
    %48 = vector.extract_strided_slice %44 {offsets = [0, 0], sizes = [4, 15], strides = [1, 1]} : vector<4x16xf32> to vector<4x15xf32>
    %49 = tpu.concatenate %45, %48 in 1 : vector<4x1xf32>, vector<4x15xf32> -> vector<4x16xf32>
    %50 = vector.extract_strided_slice %43 {offsets = [0, 1], sizes = [4, 15], strides = [1, 1]} : vector<4x16xf32> to vector<4x15xf32>
    %51 = tpu.concatenate %50, %45 in 1 : vector<4x15xf32>, vector<4x1xf32> -> vector<4x16xf32>
    %52 = vector.extract_strided_slice %44 {offsets = [0, 1], sizes = [4, 15], strides = [1, 1]} : vector<4x16xf32> to vector<4x15xf32>
    %53 = tpu.concatenate %52, %45 in 1 : vector<4x15xf32>, vector<4x1xf32> -> vector<4x16xf32>
    %54 = tpu.concatenate %47, %49 in 1 : vector<4x16xf32>, vector<4x16xf32> -> vector<4x32xf32>
    %55 = tpu.concatenate %43, %44 in 1 : vector<4x16xf32>, vector<4x16xf32> -> vector<4x32xf32>
    %56 = tpu.concatenate %51, %53 in 1 : vector<4x16xf32>, vector<4x16xf32> -> vector<4x32xf32>
    %57 = tpu.concatenate %54, %55, %56 in 0 : vector<4x32xf32>, vector<4x32xf32>, vector<4x32xf32> -> vector<12x32xf32>
    %c0_16 = arith.constant 0 : index
    %c0_17 = arith.constant 0 : index
    %58 = vector.load %arg4[%c0_16, %c0_17] : memref<4x12xf32, #tpu.memory_space<vmem>>, vector<4x12xf32>
    %cst_18 = arith.constant dense<0.000000e+00> : vector<4x32xf32>
    %59 = tpu.matmul %58, %57, %cst_18 {dimension_numbers = #tpu.dot_dimension_numbers<[1], [0], [0], [1], [0, 0, 1, 1], [], []>} : vector<4x12xf32>, vector<12x32xf32>, vector<4x32xf32> -> vector<4x32xf32>
    %cst_19 = arith.constant dense<0.000000e+00> : vector<4xf32>
    %60 = vector.multi_reduction <add>, %59, %cst_19 [1] : vector<4x32xf32> to vector<4xf32>
    %61 = vector.shape_cast %60 : vector<4xf32> to vector<4x1xf32>
    %cst_20 = arith.constant 3.125000e-02 : f32
    %62 = vector.broadcast %cst_20 : f32 to vector<4x1xf32>
    %63 = arith.mulf %61, %62 : vector<4x1xf32>
    %64 = vector.broadcast %63 : vector<4x1xf32> to vector<4x32xf32>
    %65 = arith.subf %59, %64 : vector<4x32xf32>
    %66 = arith.mulf %65, %65 : vector<4x32xf32>
    %cst_21 = arith.constant dense<0.000000e+00> : vector<4xf32>
    %67 = vector.multi_reduction <add>, %66, %cst_21 [1] : vector<4x32xf32> to vector<4xf32>
    %68 = vector.shape_cast %67 : vector<4xf32> to vector<4x1xf32>
    %cst_22 = arith.constant 3.125000e-02 : f32
    %69 = vector.broadcast %cst_22 : f32 to vector<4x1xf32>
    %70 = arith.mulf %68, %69 : vector<4x1xf32>
    %c0_23 = arith.constant 0 : index
    %c0_24 = arith.constant 0 : index
    %71 = vector.load %arg5[%c0_23, %c0_24] : memref<4x1xf32, #tpu.memory_space<vmem>>, vector<4x1xf32>
    %cst_25 = arith.constant 9.99999974E-6 : f32
    %72 = vector.broadcast %cst_25 : f32 to vector<4x1xf32>
    %73 = arith.addf %70, %72 : vector<4x1xf32>
    %74 = math.rsqrt %73 : vector<4x1xf32>
    %75 = arith.mulf %71, %74 : vector<4x1xf32>
    %76 = vector.broadcast %75 : vector<4x1xf32> to vector<4x32xf32>
    %77 = arith.mulf %65, %76 : vector<4x32xf32>
    %c0_26 = arith.constant 0 : index
    %c0_27 = arith.constant 0 : index
    %78 = vector.load %arg6[%c0_26, %c0_27] : memref<4x1xf32, #tpu.memory_space<vmem>>, vector<4x1xf32>
    %79 = vector.broadcast %78 : vector<4x1xf32> to vector<4x32xf32>
    %80 = arith.addf %77, %79 : vector<4x32xf32>
    %81 = vector.extract_strided_slice %80 {offsets = [0, 0], sizes = [4, 16], strides = [1, 1]} : vector<4x32xf32> to vector<4x16xf32>
    %82 = vector.extract_strided_slice %0 {offsets = [0, 0, 0], sizes = [1, 4, 16], strides = [1, 1, 1]} : vector<2x4x16xf32> to vector<1x4x16xf32>
    %83 = vector.shape_cast %82 : vector<1x4x16xf32> to vector<4x16xf32>
    %84 = arith.addf %81, %83 : vector<4x16xf32>
    %cst_28 = arith.constant 0.000000e+00 : f32
    %85 = vector.broadcast %cst_28 : f32 to vector<4x16xf32>
    %86 = arith.maximumf %84, %85 : vector<4x16xf32>
    %c0_29 = arith.constant 0 : index
    %c0_30 = arith.constant 0 : index
    %c0_31 = arith.constant 0 : index
    %87 = vector.load %arg7[%c0_29, %c0_30, %c0_31] : memref<2x4x16xf32, #tpu.memory_space<vmem>>, vector<1x4x16xf32>
    %88 = vector.shape_cast %87 : vector<1x4x16xf32> to vector<4x16xf32>
    %89 = vector.shape_cast %86 : vector<4x16xf32> to vector<1x4x16xf32>
    tpu.vector_store %arg7[%c0_29, %c0_30, %c0_31], %89 {strides = array<i32>} : memref<2x4x16xf32, #tpu.memory_space<vmem>>, vector<1x4x16xf32>,
    %90 = vector.extract_strided_slice %80 {offsets = [0, 16], sizes = [4, 16], strides = [1, 1]} : vector<4x32xf32> to vector<4x16xf32>
    %91 = vector.extract_strided_slice %0 {offsets = [1, 0, 0], sizes = [1, 4, 16], strides = [1, 1, 1]} : vector<2x4x16xf32> to vector<1x4x16xf32>
    %92 = vector.shape_cast %91 : vector<1x4x16xf32> to vector<4x16xf32>
    %93 = arith.addf %90, %92 : vector<4x16xf32>
    %cst_32 = arith.constant 0.000000e+00 : f32
    %94 = vector.broadcast %cst_32 : f32 to vector<4x16xf32>
    %95 = arith.maximumf %93, %94 : vector<4x16xf32>
    %c1 = arith.constant 1 : index
    %c0_33 = arith.constant 0 : index
    %c0_34 = arith.constant 0 : index
    %96 = vector.load %arg7[%c1, %c0_33, %c0_34] : memref<2x4x16xf32, #tpu.memory_space<vmem>>, vector<1x4x16xf32>
    %97 = vector.shape_cast %96 : vector<1x4x16xf32> to vector<4x16xf32>
    %98 = vector.shape_cast %95 : vector<4x16xf32> to vector<1x4x16xf32>
    tpu.vector_store %arg7[%c1, %c0_33, %c0_34], %98 {strides = array<i32>} : memref<2x4x16xf32, #tpu.memory_space<vmem>>, vector<1x4x16xf32>,
    return
  }
}

</mosaic_0001>

<bundles_post_ra>
// kernel: basic_block1d_forward.1
= control target key start
LH: loop header
LB: loop body
LE: loop exit
PB: predicated region body
PF: predicated region fallthrough
CT: control target
= control target key end

     0   :  { %s402_s28 = smov 127   ;;  %s531_s0 = inlined_call_operand.vmem [shape: f32[2,4,16], index: 0, kind: input, shape index: {}]   ;;  %s532_s1 = inlined_call_operand.vmem [shape: f32[4,12], index: 1, kind: input, shape index: {}]   ;;  %s533_s2 = inlined_call_operand.vmem [shape: f32[4,1], index: 2, kind: input, shape index: {}]   ;;  %s534_s3 = inlined_call_operand.vmem [shape: f32[4,1], index: 3, kind: input, shape index: {}]   ;;  %s535_s4 = inlined_call_operand.vmem [shape: f32[4,12], index: 4, kind: input, shape index: {}]   ;;  %s536_s5 = inlined_call_operand.vmem [shape: f32[4,1], index: 5, kind: input, shape index: {}]   ;;  %s537_s6 = inlined_call_operand.vmem [shape: f32[4,1], index: 6, kind: input, shape index: {}]   ;;  %s538_s7 = inlined_call_operand.hbm [shape: f32[2,4,16], index: 7, kind: output, shape index: {}]  }
   0x1   :  { %v28_v0 = vld [vmem:[%s531_s0 + $0x4] sm:$0xf]  ;;  %v460_v1 = vld [vmem:[%s531_s0] sm:$0xf] }
   0x2   :  { %45 = vrot.lane.b32.xlu0 %v28_v0, %s402_s28  ;;  %40 = vrot.lane.b32.xlu1 %v460_v1, %s402_s28 }
   0x3   :  { %12 = vsyncpa [#allocation3], 0  ;;  %s403_s29 = smov 1   ;;  %s404_s30 = smov 16   ;;  %v405_v2 = vmov 0.0   ;;  %vm406_vm0 = vmmov 0  }
   0x4   :  { %348 = vmatprep.subr.mxu0 %v405_v2  ;;  %355 = vmatprep.subr.mxu1 %v405_v2  ;;  %vm43_vm1 = vcmask 121856   ;;  %vm33_vm2 = vcmask 7168   ;;  %vm53_vm3 = vcmask 130048   ;;  %vm67_vm4 = vcmask 1043456   ;;  %v69_v18 = vld [vmem:[%s532_s1] sm:$0xf] }
   0x5   :  { %352 = vmatprep.mubr.msk.f32.mxu0 %vm406_vm0, %v405_v2  ;;  %359 = vmatprep.mubr.msk.f32.mxu1 %vm406_vm0, %v405_v2  ;;  %vm70_vm5 = vcmask 97280   ;;  %vm147_vm6 = vcmask 257024   ;;  %v407_v28 = vmov 0   ;;  %v168_v29 = vld [vmem:[%s534_s3] sm:$0xf]  ;;  %s408_s12 = smov 111  }
   0x6   :  { %36 = vrot.lane.b32.xlu0 %v28_v0, %s403_s29  ;;  %55 = vrot.lane.b32.xlu1 %v28_v0, %s404_s30  ;;  %v158_v33 = vld [vmem:[%s533_s2] sm:$0xf]  ;;  %s409_s3 = smov 113   ;;  %vm312_vm7 = vcmask 125952   ;;  %s411_s17 = smov [#allocation2]  }
   0x7   :  { %374 = vset.pattern.permute.xlu0 %v407_v28  ;;  %375 = vset.pattern.permute.xlu1 %v407_v28  ;;  %v206_v54 = vld [vmem:[%s535_s4] sm:$0xf]  ;;  %s327_s18 = sshll.u32 %s411_s17, 4  ;;  %s328_s18 = int_to_ptr.vmem [resolvable:$true] %s327_s18 }
   0x8   :  { %v303_v59 = vld [vmem:[%s537_s6] sm:$0xf]  ;;  %s410_s6 = smov 112   ;;  %p385_p1 = scmp.lt.s32.totalorder %s328_s18, %s328_s18 }
   0xa   :  { %30 = vrot.lane.b32.xlu0 %v460_v1, %s403_s29 }
  0x74   :  { %v46_v3 = vpop.permute.xlu0 %45  ;;  %v41_v7 = vpop.permute.xlu1 %40 }
  0x75   :  { %v48_v4 = vsel %vm43_vm1, %v46_v3, 0.0  ;;  %v44_v10 = vsel %vm43_vm1, %v41_v7, 0.0 }
  0x76   :  { %60 = vrot.lane.b32.xlu1 %v48_v4, %s404_s30 }
  0x78   :  { %v37_v5 = vpop.permute.xlu0 %36  ;;  %v477_v8 = vpop.permute.xlu1 %55 }
  0x79   :  { %v39_v6 = vsel %vm33_vm2, 0.0, %v37_v5  ;;  %v58_v12 = vsel %vm53_vm3, %v460_v1, %v477_v8  ;;  %v293_v5 = vld [vmem:[%s536_s5] sm:$0xf]  ;;  %s380_s5 = scalar_lea.vmem %s328_s18, 128 }
  0x7a   :  { %50 = vrot.lane.b32.xlu0 %v39_v6, %s404_s30  ;;  %v65_v14 = vrot.slane %v58_v12, 4  ;;  %p381_p0 = scmp.ne.s32.totalorder %s328_s18, %s380_s5  ;;  %p386_p2 = scmp.lt.s32.totalorder %s380_s5, %s380_s5 }
  0x7c   :  { %v31_v9 = vpop.permute.xlu0 %30  ;;  %p387_p3 = por %p386_p2, %p385_p1 }
  0x7d   :  { %v34_v15 = vsel %vm33_vm2, 0.0, %v31_v9 }
  0x7e   :  { %p388_p4 = pnand %p387_p3, %p381_p0 }
  0xe8   :  { %v61_v11 = vpop.permute.xlu1 %60 }
  0xe9   :  { %v63_v13 = vsel %vm53_vm3, %v44_v10, %v61_v11 }
  0xea   :  { %349 = vmatpush3.msk.msra.mxu0 %vm67_vm4, %v63_v13 }
  0xeb   :  { %350 = vmatprep.subr.mxu0 %v405_v2 }
  0xec   :  { %v51_v16 = vpop.permute.xlu0 %50 }
  0xed   :  { %v54_v17 = vsel %vm53_vm3, %v34_v15, %v51_v16 }
  0xee   :  { %v68_v19 = vsel %vm67_vm4, %v54_v17, %v65_v14 }
  0xef   :  { %351 = vmatpush3.msra.mxu0 %v68_v19 }
  0xf0   :  { %353 = vmatmul.mubr.msk.f32.vlgmr.msra.gmra.mxu0 %vm70_vm5, %v69_v18 }
 0x1b0   :  { %v143_v20 = vpop.f32.mrf.mxu0 }
 0x1b1   :  { %v148_v21 = vsel %vm147_vm6, %v143_v20, 0.0 }
 0x1b2   :  { %149 = vadd.xlane.f32.xlu1 %v148_v21  ;;  %v354_v22 = vpop.f32.mrf.mxu0 }
 0x1c3   :  { %171 = vperm.xlu1 %375, %v168_v29  }
 0x23b   :  { %v150_v23 = vpop.xlane.xlu1 %149 }
 0x23c   :  { %v151_v24 = vmul.f32 0.03125, %v150_v23 }
 0x23e   :  { %v152_v25 = vsub.f32 %v143_v20, %v151_v24 }
 0x23f   :  { %v172_v37 = vpop.permute.xlu1 %171 }
 0x240   :  { %v153_v26 = vmul.f32 %v152_v25, %v152_v25 }
 0x242   :  { %v154_v27 = vsel %vm147_vm6, %v153_v26, 0.0 }
 0x243   :  { %155 = vadd.xlane.f32.xlu0 %v154_v27 }
 0x2cc   :  { %v156_v30 = vpop.xlane.xlu0 %155 }
 0x2cd   :  { %v157_v31 = vmul.f32 0.03125, %v156_v30 }
 0x2cf   :  { %v159_v32 = vadd.f32 1e-05, %v157_v31 }
 0x2d1   :  { %376 = vrsqrt.f32 %v159_v32 }
 0x2de   :  { %v377_v34 = vpop.eup %376 }
 0x2df   :  { %v161_v35 = vmul.f32 %v377_v34, %v158_v33 }
 0x2e1   :  { %164 = vperm.xlu0 %374, %v161_v35  }
 0x35c   :  { %v165_v36 = vpop.permute.xlu0 %164 }
 0x35d   :  { %v167_v38 = vmul.f32 %v165_v36, %v152_v25 }
 0x35f   :  { %v174_v39 = vadd.f32 %v172_v37, %v167_v38 }
 0x361   :  { %v175_v40 = vmax.f32 %v174_v39, 0.0 }
 0x363   :  { %189 = vrot.lane.b32.xlu1 %v175_v40, %s408_s12  ;;  %v203_v52 = vrot.slane %v175_v40, 4 }
 0x367   :  { %181 = vrot.lane.b32.xlu1 %v175_v40, %s409_s3 }
 0x36b   :  { %185 = vrot.lane.b32.xlu1 %v175_v40, %s402_s28 }
 0x36f   :  { %177 = vrot.lane.b32.xlu1 %v175_v40, %s403_s29 }
 0x3d5   :  { %v190_v41 = vpop.permute.xlu1 %189 }
 0x3d6   :  { %v192_v42 = vsel %vm43_vm1, %v190_v41, 0.0 }
 0x3d7   :  { %199 = vrot.lane.b32.xlu1 %v192_v42, %s404_s30 }
 0x3d9   :  { %v182_v43 = vpop.permute.xlu1 %181 }
 0x3da   :  { %v184_v44 = vsel %vm33_vm2, 0.0, %v182_v43 }
 0x3db   :  { %194 = vrot.lane.b32.xlu1 %v184_v44, %s404_s30 }
 0x3dd   :  { %v186_v45 = vpop.permute.xlu1 %185 }
 0x3de   :  { %v188_v47 = vsel %vm43_vm1, %v186_v45, 0.0 }
 0x3e1   :  { %v178_v46 = vpop.permute.xlu1 %177 }
 0x3e2   :  { %v180_v50 = vsel %vm33_vm2, 0.0, %v178_v46 }
 0x449   :  { %v200_v48 = vpop.permute.xlu1 %199 }
 0x44a   :  { %v202_v49 = vsel %vm53_vm3, %v188_v47, %v200_v48 }
 0x44b   :  { %356 = vmatpush3.msk.msra.mxu1 %vm67_vm4, %v202_v49 }
 0x44c   :  { %357 = vmatprep.subr.mxu1 %v405_v2 }
 0x44d   :  { %v195_v51 = vpop.permute.xlu1 %194 }
 0x44e   :  { %v197_v53 = vsel %vm53_vm3, %v180_v50, %v195_v51 }
 0x44f   :  { %v205_v55 = vsel %vm67_vm4, %v197_v53, %v203_v52 }
 0x450   :  { %358 = vmatpush3.msra.mxu1 %v205_v55 }
 0x451   :  { %360 = vmatmul.mubr.msk.f32.vlgmr.msra.gmra.mxu1 %vm70_vm5, %v206_v54 }
 0x511   :  { %v279_v56 = vpop.f32.mrf.mxu1 }
 0x512   :  { %v283_v57 = vsel %vm147_vm6, %v279_v56, 0.0 }
 0x513   :  { %284 = vadd.xlane.f32.xlu1 %v283_v57  ;;  %v361_v58 = vpop.f32.mrf.mxu1 }
 0x524   :  { %306 = vperm.xlu1 %375, %v303_v59  }
 0x59c   :  { %v285_v60 = vpop.xlane.xlu1 %284 }
 0x59d   :  { %v286_v61 = vmul.f32 0.03125, %v285_v60 }
 0x59f   :  { %v287_v62 = vsub.f32 %v279_v56, %v286_v61 }
 0x5a0   :  { %v307_v11 = vpop.permute.xlu1 %306 }
 0x5a1   :  { %v288_v63 = vmul.f32 %v287_v62, %v287_v62 }
 0x5a3   :  { %v289_v0 = vsel %vm147_vm6, %v288_v63, 0.0 }
 0x5a4   :  { %290 = vadd.xlane.f32.xlu0 %v289_v0 }
 0x62d   :  { %v291_v2 = vpop.xlane.xlu0 %290 }
 0x62e   :  { %v292_v3 = vmul.f32 0.03125, %v291_v2 }
 0x630   :  { %v294_v4 = vadd.f32 1e-05, %v292_v3 }
 0x632   :  { %378 = vrsqrt.f32 %v294_v4 }
 0x63f   :  { %v379_v6 = vpop.eup %378 }
 0x640   :  { %v296_v7 = vmul.f32 %v379_v6, %v293_v5 }
 0x642   :  { %299 = vperm.xlu0 %374, %v296_v7  }
 0x6bd   :  { %v300_v9 = vpop.permute.xlu0 %299 }
 0x6be   :  { %v302_v10 = vmul.f32 %v300_v9, %v287_v62 }
 0x6c0   :  { %v309_v12 = vadd.f32 %v307_v11, %v302_v10 }
 0x6c2   :  { %v310_v13 = vadd.f32 %v309_v12, %v460_v1  ;;  %v314_v14 = vadd.f32 %v309_v12, %v477_v8 }
 0x6c4   :  { %v315_v15 = vmax.f32 %v314_v14, 0.0  ;;  %v311_v16 = vmax.f32 %v310_v13, 0.0 }
 0x6c6   :  { %317 = vrot.lane.b32.xlu1 %v315_v15, %s410_s6  ;;  %313 = vst.msk [vmem:[#allocation2] sm:$0xf] %vm312_vm7, %v311_v16 }
 0x738   :  { %v318_v17 = vpop.permute.xlu1 %317 }
 0x739   :  { %321 = vst.msk [vmem:[#allocation2 + $0x4] sm:$0xf] %vm312_vm7, %v318_v17 }
 0x73a   :  { %391 = shalt.err (!%p388_p4)
}
 0x73b   :  { %s412_s19 = smov 64   ;;  %s413_s20 = smov 4  }
 0x73c   :  { %333 = dma.vmem_to_hbm [thread:$0]  %s328_s18, 128, %s538_s7, [#allocation3], %s412_s19, %s412_s19, %s413_s20  }
 0x73d   :  { %400 = dma.done.wait [#allocation3], 128  }
 0x73e   :  { %401 = vsyncadd [#allocation3], 4294967168 }
 0x73f   :  { %337 = vsyncpa [#allocation3], 1 }

</bundles_post_ra>
